<compile_context>
chip_gen: v7x
topology: tpu7x:2x2x1
jax: 0.10.0
libtpu: 0.0.40
codegen_flags: <defaults>
</compile_context>

<pallas_src>
import functools

import jax
import jax.numpy as jnp
from jax.experimental import pallas as pl
from jax.experimental.pallas import tpu as pltpu


def _dice_loss_kernel(score_ref, label_ref, out_ref, acc_ref, *, inv_total):
    i = pl.program_id(0)
    j = pl.program_id(1)

    @pl.when(jnp.logical_and(i == 0, j == 0))
    def _():
        acc_ref[...] = jnp.zeros_like(acc_ref)

    s = score_ref[...]            # (NB, 2, T) f32
    lbl = label_ref[...]          # (NB, 1, T) i32

    # C == 2: softmax prob of the labeled channel = sigmoid(s[lbl] - s[1-lbl]).
    d = s[:, 1, :] - s[:, 0, :]                       # (NB, T)
    sel = jnp.where(lbl[:, 0, :] != 0, d, -d)         # (NB, T)
    p_lab = jax.nn.sigmoid(sel)                       # one EUP logistic / pixel

    # Per-lane partial accumulation (element-wise VALU add only).
    acc_ref[...] += p_lab

    last = jnp.logical_and(i == pl.num_programs(0) - 1,
                           j == pl.num_programs(1) - 1)

    @pl.when(last)
    def _():
        intersection = jnp.sum(acc_ref[...])          # single XLU reduce
        # A + B == 2 * N * H * W exactly, so dice = intersection / (N*H*W).
        out_ref[0] = 1.0 - intersection * inv_total


def _choose_tiles(N, C, HW, elem_bytes=4, target_bytes=4 << 20):
    """Pick (NB, T): batch tile and flattened-spatial tile.

    T starts at the full spatial extent and is halved (staying a multiple of
    128 that divides HW) until a single-batch score slab fits the per-block
    byte target.  NB is the largest divisor of N keeping the score block
    under the target.  The target leaves ample headroom for double-buffered
    inputs + accumulator even under v7x's 64 MiB VMEM.
    """
    T = HW
    if HW % 128 == 0:
        while T > 512 and T % 256 == 0 and C * T * elem_bytes > target_bytes:
            T //= 2
    NB = 1
    for cand in range(N, 0, -1):
        if N % cand == 0 and cand * C * T * elem_bytes <= target_bytes:
            NB = cand
            break
    return NB, T


def dice_loss(score, label):
    N, C, H, W = score.shape
    assert C == 2, "DiceLoss kernel specializes to the 2-class case (one_hot(label, 2))."
    HW = H * W

    # Free reshapes for contiguous NCHW / NHW inputs.
    score2 = score.astype(jnp.float32).reshape(N, C, HW)
    label2 = label.astype(jnp.int32).reshape(N, 1, HW)

    NB, T = _choose_tiles(N, C, HW)
    grid = (N // NB, HW // T)

    kernel = functools.partial(_dice_loss_kernel,
                               inv_total=1.0 / float(N * HW))

    out = pl.pallas_call(
        kernel,
        out_shape=jax.ShapeDtypeStruct((1,), jnp.float32),
        grid_spec=pltpu.PrefetchScalarGridSpec(
            num_scalar_prefetch=0,
            grid=grid,
            in_specs=[
                pl.BlockSpec((NB, C, T), lambda i, j: (i, 0, j)),
                pl.BlockSpec((NB, 1, T), lambda i, j: (i, 0, j)),
            ],
            out_specs=pl.BlockSpec(memory_space=pltpu.SMEM),
            scratch_shapes=[pltpu.VMEM((NB, T), jnp.float32)],
        ),
        # The VMEM accumulator is carried across both grid axes, so both stay
        # "arbitrary" (a v7x 2-TC split would need per-core partials).
        compiler_params=pltpu.CompilerParams(
            dimension_semantics=("arbitrary", "arbitrary")),
    )(score2, label2)
    return out[0]


def dice_loss_ref(score, label):
    prob = jax.nn.softmax(score.astype(jnp.float32), axis=1)
    onehot = jax.nn.one_hot(label, 2, dtype=jnp.float32)           # (N,H,W,C)
    onehot = jnp.transpose(onehot, (0, 3, 1, 2))                   # (N,C,H,W)
    inter = jnp.sum(prob * onehot)
    A = jnp.sum(prob)
    B = jnp.sum(onehot)
    return 1.0 - 2.0 * inter / (A + B)


if __name__ == "__main__":
    key = jax.random.PRNGKey(0)
    k1, k2 = jax.random.split(key)
    N, C, H, W = 2, 2, 16, 16
    score = jax.random.normal(k1, (N, C, H, W), dtype=jnp.float32)
    label = jax.random.randint(k2, (N, H, W), 0, 2, dtype=jnp.int32)

    out = dice_loss(score, label)
    out = jax.block_until_ready(out)

    ref = dice_loss_ref(score, label)
    assert jnp.allclose(out, ref, atol=1e-5, rtol=1e-5), (out, ref)
    print("KERNEL_OK")
</pallas_src>

<mosaic_0001>
module attributes {stable_mosaic.version = 11 : i64} {
  func.func @_dice_loss_kernel(%arg0: i32, %arg1: i32, %arg2: memref<2x2x256xf32, #tpu.memory_space<vmem>>, %arg3: memref<2x1x256xi32, #tpu.memory_space<vmem>>, %arg4: memref<1xf32, #tpu.memory_space<smem>>, %arg5: memref<2x256xf32, #tpu.memory_space<vmem>>) attributes {dimension_semantics = [#tpu.dimension_semantics<arbitrary>, #tpu.dimension_semantics<arbitrary>], iteration_bounds = array<i64: 1, 1>, scalar_prefetch = 0 : i64, scratch_operands = 1 : i64, tpu.core_type = #tpu.core_type<tc>, window_params = [{transform_indices = @transform_0, window_bounds = array<i64: 2, 2, 256>}, {transform_indices = @transform_1, window_bounds = array<i64: 2, 1, 256>}, {transform_indices = @transform_2, window_bounds = array<i64: 1>}]} {
    %c0_i32 = arith.constant 0 : i32
    %0 = arith.cmpi eq, %arg0, %c0_i32 : i32
    %c0_i32_0 = arith.constant 0 : i32
    %1 = arith.cmpi eq, %arg1, %c0_i32_0 : i32
    %2 = arith.andi %0, %1 : i1
    %3 = arith.extui %2 : i1 to i32
    %c0_i32_1 = arith.constant 0 : i32
    %4 = arith.cmpi ne, %3, %c0_i32_1 : i32
    scf.if %4 {
      %cst_16 = arith.constant 0.000000e+00 : f32
      %31 = vector.broadcast %cst_16 : f32 to vector<2x256xf32>
      %c0_17 = arith.constant 0 : index
      %c0_18 = arith.constant 0 : index
      %32 = vector.load %arg5[%c0_17, %c0_18] : memref<2x256xf32, #tpu.memory_space<vmem>>, vector<2x256xf32>
      tpu.vector_store %arg5[%c0_17, %c0_18], %31 {strides = array<i32>} : memref<2x256xf32, #tpu.memory_space<vmem>>, vector<2x256xf32>,
    } else {
    }
    %c0 = arith.constant 0 : index
    %c0_2 = arith.constant 0 : index
    %c0_3 = arith.constant 0 : index
    %5 = vector.load %arg2[%c0, %c0_2, %c0_3] : memref<2x2x256xf32, #tpu.memory_space<vmem>>, vector<2x2x256xf32>
    %c0_4 = arith.constant 0 : index
    %c0_5 = arith.constant 0 : index
    %c0_6 = arith.constant 0 : index
    %6 = vector.load %arg3[%c0_4, %c0_5, %c0_6] : memref<2x1x256xi32, #tpu.memory_space<vmem>>, vector<2x1x256xi32>
    %7 = vector.extract_strided_slice %5 {offsets = [0, 1, 0], sizes = [2, 1, 256], strides = [1, 1, 1]} : vector<2x2x256xf32> to vector<2x1x256xf32>
    %8 = vector.shape_cast %7 : vector<2x1x256xf32> to vector<2x256xf32>
    %9 = vector.extract_strided_slice %5 {offsets = [0, 0, 0], sizes = [2, 1, 256], strides = [1, 1, 1]} : vector<2x2x256xf32> to vector<2x1x256xf32>
    %10 = vector.shape_cast %9 : vector<2x1x256xf32> to vector<2x256xf32>
    %11 = arith.subf %8, %10 : vector<2x256xf32>
    %12 = vector.shape_cast %6 : vector<2x1x256xi32> to vector<2x256xi32>
    %c0_i32_7 = arith.constant 0 : i32
    %13 = vector.broadcast %c0_i32_7 : i32 to vector<2x256xi32>
    %14 = arith.cmpi ne, %12, %13 : vector<2x256xi32>
    %cst = arith.constant 0.000000e+00 : f32
    %15 = vector.broadcast %cst : f32 to vector<2x256xf32>
    %16 = arith.subf %15, %11 : vector<2x256xf32>
    %17 = arith.select %14, %11, %16 : vector<2x256xi1>, vector<2x256xf32>
    %18 = arith.negf %17 : vector<2x256xf32>
    %19 = math.exp %18 : vector<2x256xf32>
    %cst_8 = arith.constant 1.000000e+00 : f32
    %20 = vector.broadcast %cst_8 : f32 to vector<2x256xf32>
    %21 = arith.addf %20, %19 : vector<2x256xf32>
    %22 = arith.divf %20, %21 : vector<2x256xf32>
    %c0_9 = arith.constant 0 : index
    %c0_10 = arith.constant 0 : index
    %23 = vector.load %arg5[%c0_9, %c0_10] : memref<2x256xf32, #tpu.memory_space<vmem>>, vector<2x256xf32>
    %24 = arith.addf %23, %22 : vector<2x256xf32>
    %c0_11 = arith.constant 0 : index
    %c0_12 = arith.constant 0 : index
    %25 = vector.load %arg5[%c0_11, %c0_12] : memref<2x256xf32, #tpu.memory_space<vmem>>, vector<2x256xf32>
    tpu.vector_store %arg5[%c0_11, %c0_12], %24 {strides = array<i32>} : memref<2x256xf32, #tpu.memory_space<vmem>>, vector<2x256xf32>,
    %c0_i32_13 = arith.constant 0 : i32
    %26 = arith.cmpi eq, %arg0, %c0_i32_13 : i32
    %c0_i32_14 = arith.constant 0 : i32
    %27 = arith.cmpi eq, %arg1, %c0_i32_14 : i32
    %28 = arith.andi %26, %27 : i1
    %29 = arith.extui %28 : i1 to i32
    %c0_i32_15 = arith.constant 0 : i32
    %30 = arith.cmpi ne, %29, %c0_i32_15 : i32
    scf.if %30 {
      %c0_16 = arith.constant 0 : index
      %c0_17 = arith.constant 0 : index
      %31 = vector.load %arg5[%c0_16, %c0_17] : memref<2x256xf32, #tpu.memory_space<vmem>>, vector<2x256xf32>
      %32 = vector.shape_cast %31 : vector<2x256xf32> to vector<1x2x256xf32>
      %cst_18 = arith.constant dense<0.000000e+00> : vector<1xf32>
      %33 = vector.multi_reduction <add>, %32, %cst_18 [1, 2] : vector<1x2x256xf32> to vector<1xf32>
      %34 = vector.shape_cast %33 : vector<1xf32> to vector<1x1x1xf32>
      %35 = vector.extract %34[0, 0, 0] : f32 from vector<1x1x1xf32>
      %cst_19 = arith.constant 0.001953125 : f32
      %36 = arith.mulf %35, %cst_19 : f32
      %cst_20 = arith.constant 1.000000e+00 : f32
      %37 = arith.subf %cst_20, %36 : f32
      %c0_21 = arith.constant 0 : index
      %38 = memref.load %arg4[%c0_21] : memref<1xf32, #tpu.memory_space<smem>>
      memref.store %37, %arg4[%c0_21] : memref<1xf32, #tpu.memory_space<smem>>
    } else {
    }
    return
  }
  func.func @transform_0(%arg0: i32, %arg1: i32) -> (i32, i32, i32) {
    %c0_i32 = arith.constant 0 : i32
    %c0_i32_0 = arith.constant 0 : i32
    return %arg0, %c0_i32, %arg1 : i32, i32, i32
  }
  func.func @transform_1(%arg0: i32, %arg1: i32) -> (i32, i32, i32) {
    %c0_i32 = arith.constant 0 : i32
    %c0_i32_0 = arith.constant 0 : i32
    return %arg0, %c0_i32, %arg1 : i32, i32, i32
  }
  func.func @transform_2(%arg0: i32, %arg1: i32) -> i32 {
    %c0_i32 = arith.constant 0 : i32
    %c0_i32_0 = arith.constant 0 : i32
    return %c0_i32 : i32
  }
}

</mosaic_0001>

<bundles_post_ra>
// kernel: tpu_custom_call.1
= control target key start
LH: loop header
LB: loop body
LE: loop exit
PB: predicated region body
PF: predicated region fallthrough
CT: control target
= control target key end

     0   :  { %7 = vsyncpa [#allocation4], 0  ;;  %s321_s0 = inlined_call_operand.hbm [shape: f32[2,2,256], index: 0, kind: input, shape index: {}]   ;;  %s322_s1 = inlined_call_operand.hbm [shape: s32[2,1,256], index: 1, kind: input, shape index: {}]   ;;  %s323_s2 = inlined_call_operand.hbm [shape: f32[1], index: 2, kind: output, shape index: {}]  }
   0x1   :  { %8 = vsyncpa [#allocation7], 0 }
   0x2   :  { %9 = vsyncpa [#allocation5], 0  ;;  %s260_s9 = smov [#allocation3]   ;;  %s200_s13 = scalar_lea.hbm %s321_s0, 128 }
   0x3   :  { %s15_s10 = sshll.u32 %s260_s9, 4  ;;  %p201_p0 = scmp.ne.s32.totalorder %s321_s0, %s200_s13  ;;  %s16_s10 = int_to_ptr.vmem [resolvable:$true] %s15_s10 }
   0x4   :  { %p204_p1 = scmp.lt.u32.totalorder %s200_s13, %s321_s0 }
   0x6   :  { %p206_p2 = pnand %p204_p1, %p201_p0 }
   0x8   :  { %209 = shalt.err (!%p206_p2)
}
   0x9   :  { %s210_s18 = scalar_lea.vmem %s16_s10, 128  ;;  %p215_p4 = scmp.lt.s32.totalorder %s16_s10, %s16_s10 }
   0xa   :  { %p211_p3 = scmp.ne.s32.totalorder %s16_s10, %s210_s18  ;;  %p216_p5 = scmp.lt.s32.totalorder %s210_s18, %s210_s18 }
   0xc   :  { %p217_p6 = por %p216_p5, %p215_p4 }
   0xe   :  { %p218_p7 = pnand %p217_p6, %p211_p3 }
  0x10   :  { %221 = shalt.err (!%p218_p7)
}
  0x11   :  { %s261_s19 = smov 64   ;;  %s262_s20 = smov 4  }
  0x12   :  { %21 = dma.hbm_to_vmem [thread:$0]  %s321_s0, 128, %s16_s10, [#allocation4], %s261_s19, %s261_s19, %s262_s20  }
  0x13   :  { %s263_s23 = smov [#allocation6]   ;;  %s222_s27 = scalar_lea.hbm %s322_s1, 64 }
  0x14   :  { %s27_s24 = sshll.u32 %s263_s23, 4  ;;  %p223_p8 = scmp.ne.s32.totalorder %s322_s1, %s222_s27  ;;  %s28_s24 = int_to_ptr.vmem [resolvable:$true] %s27_s24 }
  0x15   :  { %p226_p9 = scmp.lt.u32.totalorder %s222_s27, %s322_s1 }
  0x17   :  { %p228_p10 = pnand %p226_p9, %p223_p8 }
  0x19   :  { %231 = shalt.err (!%p228_p10)
}
  0x1a   :  { %s232_s4 = scalar_lea.vmem %s28_s24, 64  ;;  %p237_p12 = scmp.lt.s32.totalorder %s28_s24, %s28_s24 }
  0x1b   :  { %p233_p11 = scmp.ne.s32.totalorder %s28_s24, %s232_s4  ;;  %p238_p13 = scmp.lt.s32.totalorder %s232_s4, %s232_s4 }
  0x1d   :  { %p239_p0 = por %p238_p13, %p237_p12 }
  0x1f   :  { %p240_p1 = pnand %p239_p0, %p233_p11 }
  0x21   :  { %243 = shalt.err (!%p240_p1)
}
  0x22   :  { %s264_s0 = smov 32   ;;  %s265_s5 = smov 2  }
  0x23   :  { %33 = dma.hbm_to_vmem [thread:$0]  %s322_s1, 64, %s28_s24, [#allocation7], %s264_s0, %s264_s0, %s265_s5  }
  0x24   :  { %254 = dma.done.wait [#allocation4], 128  }
  0x25   :  { %255 = vsyncadd [#allocation4], 4294967168 }
  0x26   :  { %256 = dma.done.wait [#allocation7], 64  }
  0x27   :  { %257 = vsyncadd [#allocation7], 4294967232  ;;  %v68_v0 = vlaneseq  ;;  %v266_v1 = vmov 0.0   ;;  %v267_v2 = vmov 1966171168   ;;  %vm145_vm2 = vcmask 1041408  }
  0x28   :  { %46 = vst [vmem:[#allocation2] sm:$0xf] %v266_v1  ;;  %v66_v3 = vunpack.c.l.s4 %v267_v2  ;;  %v47_v6 = vld [vmem:[#allocation3] sm:$0xf]  ;;  %v48_v7 = vld [vmem:[#allocation3 + $0x4] sm:$0xf] }
  0x29   :  { %v69_v5 = vshrl.u32 %v68_v0, 7  ;;  %v53_v8 = vrot.slane %v47_v6, 7  ;;  %v54_v9 = vrot.slane %v48_v7, 7  ;;  %v49_v13 = vld [vmem:[#allocation6] sm:$0x3]  ;;  %s244_s12 = scalar_lea.hbm %s323_s2, 16 }
  0x2a   :  { %v67_v4 = vunpack.c.0.s8 %v66_v3  ;;  %v50_v14 = vld [vmem:[#allocation6 + $0x2] sm:$0x3]  ;;  %vm59_vm0 = vcmp.ne.s32.totalorder %v49_v13, 0  ;;  %v268_v33 = vmov 1935823168   ;;  %p245_p2 = scmp.ne.s32.totalorder %s323_s2, %s244_s12  ;;  %p248_p3 = scmp.lt.u32.totalorder %s244_s12, %s323_s2 }
  0x2b   :  { %v57_v11 = vsub.f32 %v47_v6, %v53_v8  ;;  %v58_v12 = vsub.f32 %v48_v7, %v54_v9  ;;  %vm60_vm1 = vcmp.ne.s32.totalorder %v50_v14, 0  ;;  %v122_v34 = vunpack.c.l.s4 %v268_v33 }
  0x2c   :  { %v70_v10 = vsub.s32 %v67_v4, %v69_v5  ;;  %p250_p4 = pnand %p248_p3, %p245_p2 }
  0x2d   :  { %v61_v15 = vsub.f32 0.0, %v57_v11  ;;  %v62_v16 = vsub.f32 0.0, %v58_v12  ;;  %v123_v35 = vunpack.c.0.s8 %v122_v34 }
  0x2e   :  { %v71_v17 = vrot.slane %v57_v11, %v70_v10  ;;  %v79_v18 = vrot.slane %v58_v12, %v70_v10 }
  0x2f   :  { %v91_v21 = vrot.slane %v61_v15, %v70_v10  ;;  %v99_v22 = vrot.slane %v62_v16, %v70_v10  ;;  %v126_v37 = vsub.s32 %v123_v35, %v69_v5  ;;  %v117_v40 = vld [vmem:[#allocation2] sm:$0xf] }
  0x30   :  { %v72_v19 = vcombine.high %v71_v17, %v71_v17  ;;  %v80_v20 = vcombine.high %v79_v18, %v79_v18 }
  0x31   :  { %v92_v23 = vcombine.high %v91_v21, %v91_v21  ;;  %v100_v24 = vcombine.high %v99_v22, %v99_v22 }
  0x33   :  { %v103_v25 = vsel %vm59_vm0, %v72_v19, %v92_v23  ;;  %v104_v26 = vsel %vm60_vm1, %v80_v20, %v100_v24 }
  0x34   :  { %v177_v27 = vmul.f32 -1.442695, %v103_v25  ;;  %v178_v28 = vmul.f32 -1.442695, %v104_v26 }
  0x36   :  { %192 = vpow2.f32 %v177_v27 }
  0x37   :  { %194 = vpow2.f32 %v178_v28 }
  0x40   :  { %v193_v29 = vpop.eup %192 }
  0x41   :  { %v195_v30 = vpop.eup %194  ;;  %v111_v31 = vadd.f32 1.0, %v193_v29 }
  0x42   :  { %v112_v32 = vadd.f32 1.0, %v195_v30 }
  0x43   :  { %196 = vrcp.f32 %v111_v31 }
  0x44   :  { %198 = vrcp.f32 %v112_v32 }
  0x4d   :  { %v197_v36 = vpop.eup %196 }
  0x4e   :  { %v199_v38 = vpop.eup %198 }
  0x4f   :  { %v120_v39 = vcombine.low %v197_v36, %v199_v38 }
  0x51   :  { %v127_v41 = vrot.slane %v120_v39, %v126_v37 }
  0x53   :  { %v129_v42 = vadd.f32 %v127_v41, %v117_v40 }
  0x55   :  { %130 = vst [vmem:[#allocation2] sm:$0xf] %v129_v42 }
  0x5c   :  { %v179_v43 = vld.sshfl [vmem:[#allocation2] sm:$0x33 pattern:$0x76325410] }
  0x5d   :  { %v142_v44 = vcombine.high %v179_v43, %v179_v43  ;;  %v146_v45 = vsel %vm145_vm2, %v179_v43, 0.0 }
  0x5f   :  { %v147_v46 = vsel %vm145_vm2, %v142_v44, 0.0 }
  0x60   :  { %v148_v47 = vadd.f32 %v147_v46, %v146_v45 }
  0x62   :  { %149 = vadd.xlane.f32.xlu0 %v148_v47 }
  0xef   :  { %v150_v48 = vpop.xlane.xlu0 %149 }
  0xf0   :  { %v151_v49 = vrot.slane %v150_v48, 4 }
  0xf2   :  { %v152_v50 = vadd.f32 %v151_v49, %v150_v48 }
  0xf4   :  { %v153_v51 = vrot.slane %v152_v50, 2 }
  0xf6   :  { %v154_v52 = vadd.f32 %v153_v51, %v152_v50 }
  0xf8   :  { %v155_v53 = vrot.slane %v154_v52, 1 }
  0xfa   :  { %v156_v54 = vadd.f32 %v155_v53, %v154_v52 }
  0xfc   :  { %180 = vpush %v156_v54 }
 0x12d   :  { %s181_s1 = spop %180 }
 0x12e   :  { %s158_s8 = smul.f32 0.001953125, %s181_s1 }
 0x130   :  { %s159_s9 = ssub.f32 1.0, %s158_s8 }
 0x132   :  { %161 = sst [smem:[#allocation8]] %s159_s9 }
 0x133   :  { %253 = shalt.err (!%p250_p4)
}
 0x134   :  { %s269_s17 = smov [#allocation8]  }
 0x135   :  { %169 = dma.smem_to_hbm %s269_s17, 16, %s323_s2, [#allocation5]  }
 0x136   :  { %258 = dma.done.wait [#allocation5], 16  }
 0x137   :  { %259 = vsyncadd [#allocation5], 4294967280 }
 0x138   :  { %173 = sfence }
 0x139   :  { %174 = vsyncpa [#allocation4], 1 }
 0x13a   :  { %175 = vsyncpa [#allocation7], 1 }
 0x13b   :  { %176 = vsyncpa [#allocation5], 1 }

</bundles_post_ra>
